<compile_context>
chip_gen: v5e
topology: v5e:2x2
jax: 0.10.0
libtpu: 0.0.40
codegen_flags: <defaults>
</compile_context>

<pallas_src>
import functools

import jax
import jax.numpy as jnp
from jax.experimental import pallas as pl
from jax.experimental.pallas import tpu as pltpu

LANE = 128
SUBLANE = 8


def _round_up(n, m):
    return ((n + m - 1) // m) * m


def _default_tm():
    """Max batch tile: 256 rows on v5e, 512 on v6e/v7x (VMEM use stays tiny)."""
    try:
        kind = jax.devices()[0].device_kind.lower()
    except Exception:  # pragma: no cover - defensive
        return 256
    return 256 if "v5" in kind else 512


def _mlp_kernel(x_ref, w1_ref, b1_ref, w2_ref, b2_ref, w3_ref, b3_ref, o_ref):
    # Layer 1: Linear + ReLU.  bf16 operands on the MXU, f32 accumulation,
    # f32 bias add / ReLU.
    h1 = jnp.dot(x_ref[...], w1_ref[...], preferred_element_type=jnp.float32)
    h1 = jnp.maximum(h1 + b1_ref[...], 0.0)
    # Layer 2: Linear + ReLU.
    h2 = jnp.dot(h1.astype(w2_ref.dtype), w2_ref[...],
                 preferred_element_type=jnp.float32)
    h2 = jnp.maximum(h2 + b2_ref[...], 0.0)
    # Layer 3: Linear, no activation.
    out = jnp.dot(h2.astype(w3_ref.dtype), w3_ref[...],
                  preferred_element_type=jnp.float32)
    o_ref[...] = (out + b3_ref[...]).astype(o_ref.dtype)


@functools.partial(jax.jit, static_argnames=("tm",))
def _forward_impl(x, w1, b1, w2, b2, w3, b3, *, tm):
    batch, num_inputs = x.shape
    h1_dim, h2_dim = w1.shape[1], w2.shape[1]
    num_outputs = w3.shape[1]

    k_pad = _round_up(num_inputs, LANE)
    h1_pad = _round_up(h1_dim, LANE)      # 400 -> 512
    h2_pad = _round_up(h2_dim, LANE)      # 300 -> 384
    n_pad = _round_up(num_outputs, LANE)  # lane-dense (unmasked) output stores

    # Adaptive batch tiling: don't pad a tiny batch all the way up to `tm`.
    b_pad8 = _round_up(batch, SUBLANE)
    if b_pad8 <= tm:
        tm_eff = b_pad8            # single grid step, minimal padding
        b_pad = b_pad8
    else:
        tm_eff = tm
        b_pad = _round_up(batch, tm)

    bf = jnp.bfloat16
    # Zero-pad once in the wrapper.  Padded lanes stay exactly zero through
    # bias add + ReLU, so slicing at the end is exact.
    xp = jnp.zeros((b_pad, k_pad), bf).at[:batch, :num_inputs].set(x.astype(bf))
    w1p = jnp.zeros((k_pad, h1_pad), bf).at[:num_inputs, :h1_dim].set(w1.astype(bf))
    b1p = jnp.zeros((1, h1_pad), jnp.float32).at[0, :h1_dim].set(b1)
    w2p = jnp.zeros((h1_pad, h2_pad), bf).at[:h1_dim, :h2_dim].set(w2.astype(bf))
    b2p = jnp.zeros((1, h2_pad), jnp.float32).at[0, :h2_dim].set(b2)
    w3p = jnp.zeros((h2_pad, n_pad), bf).at[:h2_dim, :num_outputs].set(w3.astype(bf))
    b3p = jnp.zeros((1, n_pad), jnp.float32).at[0, :num_outputs].set(b3)

    grid = (b_pad // tm_eff,)

    flops = 2 * batch * (num_inputs * h1_dim + h1_dim * h2_dim
                         + h2_dim * num_outputs)
    bytes_accessed = (xp.size * 2 + w1p.size * 2 + w2p.size * 2 + w3p.size * 2
                      + (b1p.size + b2p.size + b3p.size) * 4
                      + b_pad * n_pad * 4)

    out = pl.pallas_call(
        _mlp_kernel,
        out_shape=jax.ShapeDtypeStruct((b_pad, n_pad), jnp.float32),
        grid=grid,
        in_specs=[
            # Batch tile of activations: auto-pipelined across grid steps.
            pl.BlockSpec((tm_eff, k_pad), lambda i: (i, 0)),
            # Weights / biases: same block every step -> DMA'd once, VMEM-resident.
            pl.BlockSpec((k_pad, h1_pad), lambda i: (0, 0)),
            pl.BlockSpec((1, h1_pad), lambda i: (0, 0)),
            pl.BlockSpec((h1_pad, h2_pad), lambda i: (0, 0)),
            pl.BlockSpec((1, h2_pad), lambda i: (0, 0)),
            pl.BlockSpec((h2_pad, n_pad), lambda i: (0, 0)),
            pl.BlockSpec((1, n_pad), lambda i: (0, 0)),
        ],
        out_specs=pl.BlockSpec((tm_eff, n_pad), lambda i: (i, 0)),
        compiler_params=pltpu.CompilerParams(
            dimension_semantics=("parallel",)),  # megacore sharding on v7x
        cost_estimate=pl.CostEstimate(
            flops=flops, transcendentals=0, bytes_accessed=bytes_accessed),
    )(xp, w1p, b1p, w2p, b2p, w3p, b3p)

    return out[:batch, :num_outputs]


def mlp_base_forward(x, params, tm=None):
    """Runs MLPBase.forward on TPU via Pallas.

    x: (batch, num_inputs) float32
    params: dict with w1 (in,400), b1 (400,), w2 (400,300), b2 (300,),
            w3 (300,out), b3 (out,) -- weights already in (in, out) layout.
    """
    if tm is None:
        tm = _default_tm()
    return _forward_impl(x, params["w1"], params["b1"], params["w2"],
                         params["b2"], params["w3"], params["b3"], tm=tm)


def init_mlp_params(key, num_inputs, num_outputs):
    """Deterministic synthetic init matching nn.Linear parameter shapes.

    PyTorch stores weight as (out, in); we build directly in (in, out) layout,
    which is the transpose used by the kernel (mathematically identical).
    """
    k1, k2, k3, k4, k5, k6 = jax.random.split(key, 6)

    def uniform(k, shape, fan_in):
        bound = 1.0 / jnp.sqrt(jnp.float32(fan_in))
        return jax.random.uniform(k, shape, jnp.float32, -bound, bound)

    return {
        "w1": uniform(k1, (num_inputs, 400), num_inputs),
        "b1": uniform(k2, (400,), num_inputs),
        "w2": uniform(k3, (400, 300), 400),
        "b2": uniform(k4, (300,), 400),
        "w3": uniform(k5, (300, num_outputs), 300),
        "b3": uniform(k6, (num_outputs,), 300),
    }


def mlp_base_reference(x, params):
    """Pure-f32 reference (matches the PyTorch module exactly)."""
    h1 = jnp.maximum(x @ params["w1"] + params["b1"], 0.0)
    h2 = jnp.maximum(h1 @ params["w2"] + params["b2"], 0.0)
    return h2 @ params["w3"] + params["b3"]


def mlp_base_reference_bf16(x, params):
    """Reference mirroring the kernel's bf16-operand / f32-accumulate math."""
    bf = jnp.bfloat16
    h1 = jnp.maximum(
        jnp.dot(x.astype(bf), params["w1"].astype(bf),
                preferred_element_type=jnp.float32) + params["b1"], 0.0)
    h2 = jnp.maximum(
        jnp.dot(h1.astype(bf), params["w2"].astype(bf),
                preferred_element_type=jnp.float32) + params["b2"], 0.0)
    return jnp.dot(h2.astype(bf), params["w3"].astype(bf),
                   preferred_element_type=jnp.float32) + params["b3"]


if __name__ == "__main__":
    key = jax.random.PRNGKey(0)
    kx, kp = jax.random.split(key)

    batch = 8
    num_inputs = 32
    num_outputs = 8

    x = jax.random.normal(kx, (batch, num_inputs), jnp.float32)
    params = init_mlp_params(kp, num_inputs, num_outputs)

    out = mlp_base_forward(x, params)
    out = jax.block_until_ready(out)
    assert out.shape == (batch, num_outputs)

    # Tight check vs the same bf16/f32-accumulate math; loose check vs pure f32
    # (difference is only bf16 weight/activation quantization).
    ref_bf16 = mlp_base_reference_bf16(x, params)
    ref_f32 = mlp_base_reference(x, params)
    assert jnp.allclose(out, ref_bf16, atol=2e-3, rtol=2e-3)
    assert jnp.allclose(out, ref_f32, atol=5e-2, rtol=5e-2)

    # Also exercise the multi-tile (grid > 1) path with a larger batch.
    big_batch = 1024
    xb = jax.random.normal(kx, (big_batch, num_inputs), jnp.float32)
    out_big = jax.block_until_ready(mlp_base_forward(xb, params, tm=256))
    assert out_big.shape == (big_batch, num_outputs)
    assert jnp.allclose(out_big, mlp_base_reference_bf16(xb, params),
                        atol=2e-3, rtol=2e-3)

    print("KERNEL_OK")
</pallas_src>

<mosaic_0001>
module attributes {stable_mosaic.version = 11 : i64} {
  func.func @_mlp_kernel(%arg0: i32, %arg1: memref<8x128xbf16, #tpu.memory_space<vmem>>, %arg2: memref<128x512xbf16, #tpu.memory_space<vmem>>, %arg3: memref<1x512xf32, #tpu.memory_space<vmem>>, %arg4: memref<512x384xbf16, #tpu.memory_space<vmem>>, %arg5: memref<1x384xf32, #tpu.memory_space<vmem>>, %arg6: memref<384x128xbf16, #tpu.memory_space<vmem>>, %arg7: memref<1x128xf32, #tpu.memory_space<vmem>>, %arg8: memref<8x128xf32, #tpu.memory_space<vmem>>) attributes {dimension_semantics = [#tpu.dimension_semantics<parallel>], iteration_bounds = array<i64: 1>, scalar_prefetch = 0 : i64, scratch_operands = 0 : i64, tpu.core_type = #tpu.core_type<tc>, window_params = [{transform_indices = @transform_0, window_bounds = array<i64: 8, 128>}, {pipeline_mode = #tpu.pipeline_mode<synchronous>, transform_indices = @transform_1, window_bounds = array<i64: 128, 512>}, {pipeline_mode = #tpu.pipeline_mode<synchronous>, transform_indices = @transform_2, window_bounds = array<i64: 1, 512>}, {pipeline_mode = #tpu.pipeline_mode<synchronous>, transform_indices = @transform_3, window_bounds = array<i64: 512, 384>}, {pipeline_mode = #tpu.pipeline_mode<synchronous>, transform_indices = @transform_4, window_bounds = array<i64: 1, 384>}, {pipeline_mode = #tpu.pipeline_mode<synchronous>, transform_indices = @transform_5, window_bounds = array<i64: 384, 128>}, {pipeline_mode = #tpu.pipeline_mode<synchronous>, transform_indices = @transform_6, window_bounds = array<i64: 1, 128>}, {transform_indices = @transform_7, window_bounds = array<i64: 8, 128>}]} {
    %c0 = arith.constant 0 : index
    %c0_0 = arith.constant 0 : index
    %0 = vector.load %arg1[%c0, %c0_0] : memref<8x128xbf16, #tpu.memory_space<vmem>>, vector<8x128xbf16>
    %c0_1 = arith.constant 0 : index
    %c0_2 = arith.constant 0 : index
    %1 = vector.load %arg2[%c0_1, %c0_2] : memref<128x512xbf16, #tpu.memory_space<vmem>>, vector<128x512xbf16>
    %cst = arith.constant dense<0.000000e+00> : vector<8x512xf32>
    %2 = tpu.matmul %0, %1, %cst {dimension_numbers = #tpu.dot_dimension_numbers<[1], [0], [0], [1], [0, 0, 1, 1], [], []>} : vector<8x128xbf16>, vector<128x512xbf16>, vector<8x512xf32> -> vector<8x512xf32>
    %c0_3 = arith.constant 0 : index
    %c0_4 = arith.constant 0 : index
    %3 = vector.load %arg3[%c0_3, %c0_4] : memref<1x512xf32, #tpu.memory_space<vmem>>, vector<1x512xf32>
    %4 = vector.broadcast %3 : vector<1x512xf32> to vector<8x512xf32>
    %5 = arith.addf %2, %4 : vector<8x512xf32>
    %cst_5 = arith.constant 0.000000e+00 : f32
    %6 = vector.broadcast %cst_5 : f32 to vector<8x512xf32>
    %7 = arith.maximumf %5, %6 : vector<8x512xf32>
    %8 = arith.truncf %7 : vector<8x512xf32> to vector<8x512xbf16>
    %c0_6 = arith.constant 0 : index
    %c0_7 = arith.constant 0 : index
    %9 = vector.load %arg4[%c0_6, %c0_7] : memref<512x384xbf16, #tpu.memory_space<vmem>>, vector<512x384xbf16>
    %cst_8 = arith.constant dense<0.000000e+00> : vector<8x384xf32>
    %10 = tpu.matmul %8, %9, %cst_8 {dimension_numbers = #tpu.dot_dimension_numbers<[1], [0], [0], [1], [0, 0, 1, 1], [], []>} : vector<8x512xbf16>, vector<512x384xbf16>, vector<8x384xf32> -> vector<8x384xf32>
    %c0_9 = arith.constant 0 : index
    %c0_10 = arith.constant 0 : index
    %11 = vector.load %arg5[%c0_9, %c0_10] : memref<1x384xf32, #tpu.memory_space<vmem>>, vector<1x384xf32>
    %12 = vector.broadcast %11 : vector<1x384xf32> to vector<8x384xf32>
    %13 = arith.addf %10, %12 : vector<8x384xf32>
    %cst_11 = arith.constant 0.000000e+00 : f32
    %14 = vector.broadcast %cst_11 : f32 to vector<8x384xf32>
    %15 = arith.maximumf %13, %14 : vector<8x384xf32>
    %16 = arith.truncf %15 : vector<8x384xf32> to vector<8x384xbf16>
    %c0_12 = arith.constant 0 : index
    %c0_13 = arith.constant 0 : index
    %17 = vector.load %arg6[%c0_12, %c0_13] : memref<384x128xbf16, #tpu.memory_space<vmem>>, vector<384x128xbf16>
    %cst_14 = arith.constant dense<0.000000e+00> : vector<8x128xf32>
    %18 = tpu.matmul %16, %17, %cst_14 {dimension_numbers = #tpu.dot_dimension_numbers<[1], [0], [0], [1], [0, 0, 1, 1], [], []>} : vector<8x384xbf16>, vector<384x128xbf16>, vector<8x128xf32> -> vector<8x128xf32>
    %c0_15 = arith.constant 0 : index
    %c0_16 = arith.constant 0 : index
    %19 = vector.load %arg7[%c0_15, %c0_16] : memref<1x128xf32, #tpu.memory_space<vmem>>, vector<1x128xf32>
    %20 = vector.broadcast %19 : vector<1x128xf32> to vector<8x128xf32>
    %21 = arith.addf %18, %20 : vector<8x128xf32>
    %c0_17 = arith.constant 0 : index
    %c0_18 = arith.constant 0 : index
    %22 = vector.load %arg8[%c0_17, %c0_18] : memref<8x128xf32, #tpu.memory_space<vmem>>, vector<8x128xf32>
    tpu.vector_store %arg8[%c0_17, %c0_18], %21 {strides = array<i32>} : memref<8x128xf32, #tpu.memory_space<vmem>>, vector<8x128xf32>,
    return
  }
  func.func @transform_0(%arg0: i32) -> (i32, i32) {
    %c0_i32 = arith.constant 0 : i32
    %c0_i32_0 = arith.constant 0 : i32
    return %arg0, %c0_i32 : i32, i32
  }
  func.func @transform_1(%arg0: i32) -> (i32, i32) {
    %c0_i32 = arith.constant 0 : i32
    %c0_i32_0 = arith.constant 0 : i32
    %c0_i32_1 = arith.constant 0 : i32
    return %c0_i32, %c0_i32_0 : i32, i32
  }
  func.func @transform_2(%arg0: i32) -> (i32, i32) {
    %c0_i32 = arith.constant 0 : i32
    %c0_i32_0 = arith.constant 0 : i32
    %c0_i32_1 = arith.constant 0 : i32
    return %c0_i32, %c0_i32_0 : i32, i32
  }
  func.func @transform_3(%arg0: i32) -> (i32, i32) {
    %c0_i32 = arith.constant 0 : i32
    %c0_i32_0 = arith.constant 0 : i32
    %c0_i32_1 = arith.constant 0 : i32
    return %c0_i32, %c0_i32_0 : i32, i32
  }
  func.func @transform_4(%arg0: i32) -> (i32, i32) {
    %c0_i32 = arith.constant 0 : i32
    %c0_i32_0 = arith.constant 0 : i32
    %c0_i32_1 = arith.constant 0 : i32
    return %c0_i32, %c0_i32_0 : i32, i32
  }
  func.func @transform_5(%arg0: i32) -> (i32, i32) {
    %c0_i32 = arith.constant 0 : i32
    %c0_i32_0 = arith.constant 0 : i32
    %c0_i32_1 = arith.constant 0 : i32
    return %c0_i32, %c0_i32_0 : i32, i32
  }
  func.func @transform_6(%arg0: i32) -> (i32, i32) {
    %c0_i32 = arith.constant 0 : i32
    %c0_i32_0 = arith.constant 0 : i32
    %c0_i32_1 = arith.constant 0 : i32
    return %c0_i32, %c0_i32_0 : i32, i32
  }
  func.func @transform_7(%arg0: i32) -> (i32, i32) {
    %c0_i32 = arith.constant 0 : i32
    %c0_i32_0 = arith.constant 0 : i32
    return %arg0, %c0_i32 : i32, i32
  }
}

</mosaic_0001>

<bundles_post_ra>
// kernel: _forward_impl.1
= control target key start
LH: loop header
LB: loop body
LE: loop exit
PB: predicated region body
PF: predicated region fallthrough
CT: control target
= control target key end

     0   :  { %s3056_s0 = inlined_call_operand.vmem [shape: bf16[8,128], index: 0, kind: input, shape index: {}]   ;;  %s3057_s1 = inlined_call_operand.vmem [shape: bf16[128,512], index: 1, kind: input, shape index: {}]   ;;  %s3058_s2 = inlined_call_operand.vmem [shape: f32[1,512], index: 2, kind: input, shape index: {}]   ;;  %s3059_s3 = inlined_call_operand.vmem [shape: bf16[512,384], index: 3, kind: input, shape index: {}]   ;;  %s3060_s4 = inlined_call_operand.vmem [shape: f32[1,384], index: 4, kind: input, shape index: {}]   ;;  %s3061_s5 = inlined_call_operand.vmem [shape: bf16[384,128], index: 5, kind: input, shape index: {}]   ;;  %s3062_s6 = inlined_call_operand.vmem [shape: f32[1,128], index: 6, kind: input, shape index: {}]   ;;  %s3063_s7 = inlined_call_operand.hbm [shape: f32[8,128], index: 7, kind: output, shape index: {}]  }
   0x1   :  { %v1466_v0 = vld [vmem:[%s3057_s1 + $0xe0] sm:$0xf]  ;;  %v1990_v1 = vld [vmem:[%s3057_s1 + $0xec] sm:$0xf0]  ;;  %v1988_v2 = vld [vmem:[%s3057_s1 + $0xe4] sm:$0xf] }
   0x2   :  { %v1467_v3 = vor.u32 %v1990_v1, %v1466_v0  ;;  %v1468_v4 = vld [vmem:[%s3057_s1 + $0xf0] sm:$0xf0]  ;;  %v1474_v5 = vld [vmem:[%s3057_s1 + $0xe8] sm:$0xf]  ;;  %v1991_v6 = vld [vmem:[%s3057_s1 + $0xf4] sm:$0xf0] }
   0x3   :  { %v1471_v7 = vor.u32 %v1988_v2, %v1468_v4  ;;  %v1475_v8 = vor.u32 %v1991_v6, %v1474_v5  ;;  %v1989_v9 = vld [vmem:[%s3057_s1 + $0xec] sm:$0xf]  ;;  %v1476_v10 = vld [vmem:[%s3057_s1 + $0xf8] sm:$0xf0]  ;;  %v1450_v11 = vld [vmem:[%s3057_s1 + $0xc0] sm:$0xf] }
   0x4   :  { %230 = vmatpush.bf16.msra.mxu0 %v1467_v3  ;;  %v1479_v12 = vor.u32 %v1989_v9, %v1476_v10  ;;  %v1986_v13 = vld [vmem:[%s3057_s1 + $0xcc] sm:$0xf0]  ;;  %v1984_v14 = vld [vmem:[%s3057_s1 + $0xc4] sm:$0xf]  ;;  %v1452_v15 = vld [vmem:[%s3057_s1 + $0xd0] sm:$0xf0] }
   0x5   :  { %243 = vmatpush.bf16.msra.mxu1 %v1471_v7  ;;  %256 = vmatpush.bf16.msra.mxu2 %v1475_v8  ;;  %v1451_v16 = vor.u32 %v1986_v13, %v1450_v11  ;;  %v1455_v17 = vor.u32 %v1984_v14, %v1452_v15  ;;  %v1458_v18 = vld [vmem:[%s3057_s1 + $0xc8] sm:$0xf]  ;;  %v1987_v19 = vld [vmem:[%s3057_s1 + $0xd4] sm:$0xf0]  ;;  %v1985_v20 = vld [vmem:[%s3057_s1 + $0xcc] sm:$0xf] }
   0x6   :  { %269 = vmatpush.bf16.msra.mxu3 %v1479_v12  ;;  %v1459_v21 = vor.u32 %v1987_v19, %v1458_v18  ;;  %v1460_v22 = vld [vmem:[%s3057_s1 + $0xd8] sm:$0xf0]  ;;  %v1434_v23 = vld [vmem:[%s3057_s1 + $0xa0] sm:$0xf]  ;;  %v1982_v24 = vld [vmem:[%s3057_s1 + $0xac] sm:$0xf0] }
   0x7   :  { %v1463_v25 = vor.u32 %v1985_v20, %v1460_v22  ;;  %v1980_v26 = vld [vmem:[%s3057_s1 + $0xa4] sm:$0xf]  ;;  %v1436_v27 = vld [vmem:[%s3057_s1 + $0xb0] sm:$0xf0]  ;;  %v1442_v28 = vld [vmem:[%s3057_s1 + $0xa8] sm:$0xf]  ;;  %v1435_v29 = vor.u32 %v1982_v24, %v1434_v23 }
   0x8   :  { %231 = vmatpush.bf16.msra.mxu0 %v1451_v16  ;;  %v1983_v30 = vld [vmem:[%s3057_s1 + $0xb4] sm:$0xf0]  ;;  %v1981_v31 = vld [vmem:[%s3057_s1 + $0xac] sm:$0xf]  ;;  %v1444_v32 = vld [vmem:[%s3057_s1 + $0xb8] sm:$0xf0]  ;;  %v1439_v33 = vor.u32 %v1980_v26, %v1436_v27 }
   0x9   :  { %244 = vmatpush.bf16.msra.mxu1 %v1455_v17  ;;  %257 = vmatpush.bf16.msra.mxu2 %v1459_v21  ;;  %v1443_v34 = vor.u32 %v1983_v30, %v1442_v28  ;;  %v1418_v35 = vld [vmem:[%s3057_s1 + $0x80] sm:$0xf]  ;;  %v1978_v36 = vld [vmem:[%s3057_s1 + $0x8c] sm:$0xf0]  ;;  %v1976_v37 = vld [vmem:[%s3057_s1 + $0x84] sm:$0xf]  ;;  %v1447_v38 = vor.u32 %v1981_v31, %v1444_v32 }
   0xa   :  { %270 = vmatpush.bf16.msra.mxu3 %v1463_v25  ;;  %v1420_v39 = vld [vmem:[%s3057_s1 + $0x90] sm:$0xf0]  ;;  %v1426_v40 = vld [vmem:[%s3057_s1 + $0x88] sm:$0xf]  ;;  %v1979_v41 = vld [vmem:[%s3057_s1 + $0x94] sm:$0xf0]  ;;  %v1419_v44 = vor.u32 %v1978_v36, %v1418_v35 }
   0xb   :  { %v1977_v42 = vld [vmem:[%s3057_s1 + $0x8c] sm:$0xf]  ;;  %v1428_v43 = vld [vmem:[%s3057_s1 + $0x98] sm:$0xf0]  ;;  %v1423_v45 = vor.u32 %v1976_v37, %v1420_v39  ;;  %v1427_v46 = vor.u32 %v1979_v41, %v1426_v40  ;;  %v1402_v47 = vld [vmem:[%s3057_s1 + $0x60] sm:$0xf] }
   0xc   :  { %232 = vmatpush.bf16.msra.mxu0 %v1435_v29  ;;  %v1974_v48 = vld [vmem:[%s3057_s1 + $0x6c] sm:$0xf0]  ;;  %v1972_v49 = vld [vmem:[%s3057_s1 + $0x64] sm:$0xf]  ;;  %v1431_v50 = vor.u32 %v1977_v42, %v1428_v43  ;;  %v1404_v51 = vld [vmem:[%s3057_s1 + $0x70] sm:$0xf0] }
   0xd   :  { %245 = vmatpush.bf16.msra.mxu1 %v1439_v33  ;;  %258 = vmatpush.bf16.msra.mxu2 %v1443_v34  ;;  %v1410_v52 = vld [vmem:[%s3057_s1 + $0x68] sm:$0xf]  ;;  %v1975_v53 = vld [vmem:[%s3057_s1 + $0x74] sm:$0xf0]  ;;  %v1973_v54 = vld [vmem:[%s3057_s1 + $0x6c] sm:$0xf]  ;;  %v1403_v56 = vor.u32 %v1974_v48, %v1402_v47  ;;  %v1407_v57 = vor.u32 %v1972_v49, %v1404_v51 }
   0xe   :  { %271 = vmatpush.bf16.msra.mxu3 %v1447_v38  ;;  %v1412_v55 = vld [vmem:[%s3057_s1 + $0x78] sm:$0xf0]  ;;  %v1411_v58 = vor.u32 %v1975_v53, %v1410_v52  ;;  %v1386_v59 = vld [vmem:[%s3057_s1 + $0x40] sm:$0xf]  ;;  %v1970_v60 = vld [vmem:[%s3057_s1 + $0x4c] sm:$0xf0] }
   0xf   :  { %v1968_v61 = vld [vmem:[%s3057_s1 + $0x44] sm:$0xf]  ;;  %v1415_v62 = vor.u32 %v1973_v54, %v1412_v55  ;;  %v1388_v63 = vld [vmem:[%s3057_s1 + $0x50] sm:$0xf0]  ;;  %v1394_v0 = vld [vmem:[%s3057_s1 + $0x48] sm:$0xf]  ;;  %v1387_v4 = vor.u32 %v1970_v60, %v1386_v59 }
  0x10   :  { %233 = vmatpush.bf16.msra.mxu0 %v1419_v44  ;;  %v1971_v1 = vld [vmem:[%s3057_s1 + $0x54] sm:$0xf0]  ;;  %v1969_v2 = vld [vmem:[%s3057_s1 + $0x4c] sm:$0xf]  ;;  %v1396_v3 = vld [vmem:[%s3057_s1 + $0x58] sm:$0xf0]  ;;  %v1391_v5 = vor.u32 %v1968_v61, %v1388_v63 }
  0x11   :  { %246 = vmatpush.bf16.msra.mxu1 %v1423_v45  ;;  %259 = vmatpush.bf16.msra.mxu2 %v1427_v46  ;;  %v1395_v6 = vor.u32 %v1971_v1, %v1394_v0  ;;  %v1370_v7 = vld [vmem:[%s3057_s1 + $0x20] sm:$0xf]  ;;  %v1966_v8 = vld [vmem:[%s3057_s1 + $0x2c] sm:$0xf0]  ;;  %v1964_v9 = vld [vmem:[%s3057_s1 + $0x24] sm:$0xf]  ;;  %v1399_v10 = vor.u32 %v1969_v2, %v1396_v3 }
  0x12   :  { %272 = vmatpush.bf16.msra.mxu3 %v1431_v50  ;;  %v1372_v11 = vld [vmem:[%s3057_s1 + $0x30] sm:$0xf0]  ;;  %v1378_v12 = vld [vmem:[%s3057_s1 + $0x28] sm:$0xf]  ;;  %v1967_v13 = vld [vmem:[%s3057_s1 + $0x34] sm:$0xf0]  ;;  %v1371_v16 = vor.u32 %v1966_v8, %v1370_v7 }
  0x13   :  { %v1965_v14 = vld [vmem:[%s3057_s1 + $0x2c] sm:$0xf]  ;;  %v1380_v15 = vld [vmem:[%s3057_s1 + $0x38] sm:$0xf0]  ;;  %v1354_v17 = vld [vmem:[%s3057_s1] sm:$0xf]  ;;  %v1375_v18 = vor.u32 %v1964_v9, %v1372_v11  ;;  %v1379_v19 = vor.u32 %v1967_v13, %v1378_v12 }
  0x14   :  { %234 = vmatpush.bf16.msra.mxu0 %v1403_v56  ;;  %v1962_v20 = vld [vmem:[%s3057_s1 + $0xc] sm:$0xf0]  ;;  %v1960_v21 = vld [vmem:[%s3057_s1 + $0x4] sm:$0xf]  ;;  %v1356_v22 = vld [vmem:[%s3057_s1 + $0x10] sm:$0xf0]  ;;  %v1383_v23 = vor.u32 %v1965_v14, %v1380_v15 }
  0x15   :  { %247 = vmatpush.bf16.msra.mxu1 %v1407_v57  ;;  %260 = vmatpush.bf16.msra.mxu2 %v1411_v58  ;;  %v1362_v24 = vld [vmem:[%s3057_s1 + $0x8] sm:$0xf]  ;;  %v1963_v25 = vld [vmem:[%s3057_s1 + $0x14] sm:$0xf0]  ;;  %v1961_v26 = vld [vmem:[%s3057_s1 + $0xc] sm:$0xf]  ;;  %v1355_v30 = vor.u32 %v1962_v20, %v1354_v17  ;;  %v1359_v33 = vor.u32 %v1960_v21, %v1356_v22 }
  0x16   :  { %273 = vmatpush.bf16.msra.mxu3 %v1415_v62  ;;  %v1364_v27 = vld [vmem:[%s3057_s1 + $0x18] sm:$0xf0]  ;;  %v1566_v28 = vld [vmem:[%s3059_s3 + $0xa8] sm:$0xf]  ;;  %v2014_v29 = vld [vmem:[%s3059_s3 + $0xb0] sm:$0xf0]  ;;  %v1363_v34 = vor.u32 %v1963_v25, %v1362_v24 }
  0x17   :  { %v1662_v31 = vld [vmem:[%s3059_s3 + $0x168] sm:$0xf]  ;;  %v2038_v32 = vld [vmem:[%s3059_s3 + $0x170] sm:$0xf0]  ;;  %v1367_v35 = vor.u32 %v1961_v26, %v1364_v27  ;;  %v1567_v36 = vor.u32 %v2014_v29, %v1566_v28  ;;  %v1554_v37 = vld [vmem:[%s3059_s3 + $0x90] sm:$0xf] }
  0x18   :  { %235 = vmatpush.bf16.msra.mxu0 %v1387_v4  ;;  %v1758_v38 = vld [vmem:[%s3059_s3 + $0x228] sm:$0xf]  ;;  %v2062_v39 = vld [vmem:[%s3059_s3 + $0x230] sm:$0xf0]  ;;  %v1663_v40 = vor.u32 %v2038_v32, %v1662_v31  ;;  %v2011_v41 = vld [vmem:[%s3059_s3 + $0x98] sm:$0xf0] }
  0x19   :  { %248 = vmatpush.bf16.msra.mxu1 %v1391_v5  ;;  %261 = vmatpush.bf16.msra.mxu2 %v1395_v6  ;;  %v1854_v42 = vld [vmem:[%s3059_s3 + $0x2e8] sm:$0xf]  ;;  %v2086_v43 = vld [vmem:[%s3059_s3 + $0x2f0] sm:$0xf0]  ;;  %v27_v44 = vld [vmem:[%s3056_s0] sm:$0xf]  ;;  %v1759_v47 = vor.u32 %v2062_v39, %v1758_v38  ;;  %v1555_v48 = vor.u32 %v2011_v41, %v1554_v37 }
  0x1a   :  { %274 = vmatpush.bf16.msra.mxu3 %v1399_v10  ;;  %v1650_v45 = vld [vmem:[%s3059_s3 + $0x150] sm:$0xf]  ;;  %v2035_v46 = vld [vmem:[%s3059_s3 + $0x158] sm:$0xf0]  ;;  %v1855_v49 = vor.u32 %v2086_v43, %v1854_v42  ;;  %v1542_v50 = vld [vmem:[%s3059_s3 + $0x78] sm:$0xf] }
  0x1b   :  { %v1746_v51 = vld [vmem:[%s3059_s3 + $0x210] sm:$0xf]  ;;  %v2059_v52 = vld [vmem:[%s3059_s3 + $0x218] sm:$0xf0]  ;;  %v1651_v53 = vor.u32 %v2035_v46, %v1650_v45  ;;  %v2008_v54 = vld [vmem:[%s3059_s3 + $0x80] sm:$0xf0] }
  0x1c   :  { %236 = vmatpush.bf16.msra.mxu0 %v1371_v16  ;;  %v1842_v55 = vld [vmem:[%s3059_s3 + $0x2d0] sm:$0xf]  ;;  %v2083_v56 = vld [vmem:[%s3059_s3 + $0x2d8] sm:$0xf0]  ;;  %v1638_v57 = vld [vmem:[%s3059_s3 + $0x138] sm:$0xf]  ;;  %v1747_v59 = vor.u32 %v2059_v52, %v1746_v51  ;;  %v1543_v60 = vor.u32 %v2008_v54, %v1542_v50 }
  0x1d   :  { %249 = vmatpush.bf16.msra.mxu1 %v1375_v18  ;;  %262 = vmatpush.bf16.msra.mxu2 %v1379_v19  ;;  %v2032_v58 = vld [vmem:[%s3059_s3 + $0x140] sm:$0xf0]  ;;  %v1843_v61 = vor.u32 %v2083_v56, %v1842_v55  ;;  %v1530_v62 = vld [vmem:[%s3059_s3 + $0x60] sm:$0xf]  ;;  %v1734_v63 = vld [vmem:[%s3059_s3 + $0x1f8] sm:$0xf] }
  0x1e   :  { %275 = vmatpush.bf16.msra.mxu3 %v1383_v23  ;;  %v2056_v0 = vld [vmem:[%s3059_s3 + $0x200] sm:$0xf0]  ;;  %v1639_v1 = vor.u32 %v2032_v58, %v1638_v57  ;;  %v2005_v2 = vld [vmem:[%s3059_s3 + $0x68] sm:$0xf0]  ;;  %v1830_v3 = vld [vmem:[%s3059_s3 + $0x2b8] sm:$0xf] }
  0x1f   :  { %v2080_v4 = vld [vmem:[%s3059_s3 + $0x2c0] sm:$0xf0]  ;;  %v1626_v5 = vld [vmem:[%s3059_s3 + $0x120] sm:$0xf]  ;;  %v2029_v6 = vld [vmem:[%s3059_s3 + $0x128] sm:$0xf0]  ;;  %v1735_v7 = vor.u32 %v2056_v0, %v1734_v63  ;;  %v1531_v8 = vor.u32 %v2005_v2, %v1530_v62 }
  0x20   :  { %237 = vmatpush.bf16.msra.mxu0 %v1355_v30  ;;  %v1831_v9 = vor.u32 %v2080_v4, %v1830_v3  ;;  %v1518_v10 = vld [vmem:[%s3059_s3 + $0x48] sm:$0xf]  ;;  %v1722_v11 = vld [vmem:[%s3059_s3 + $0x1e0] sm:$0xf]  ;;  %v2053_v12 = vld [vmem:[%s3059_s3 + $0x1e8] sm:$0xf0]  ;;  %v1627_v13 = vor.u32 %v2029_v6, %v1626_v5 }
  0x21   :  { %250 = vmatpush.bf16.msra.mxu1 %v1359_v33  ;;  %263 = vmatpush.bf16.msra.mxu2 %v1363_v34  ;;  %v2002_v14 = vld [vmem:[%s3059_s3 + $0x50] sm:$0xf0]  ;;  %v1818_v15 = vld [vmem:[%s3059_s3 + $0x2a0] sm:$0xf]  ;;  %v2077_v16 = vld [vmem:[%s3059_s3 + $0x2a8] sm:$0xf0]  ;;  %v1723_v19 = vor.u32 %v2053_v12, %v1722_v11 }
  0x22   :  { %276 = vmatpush.bf16.msra.mxu3 %v1367_v35  ;;  %v1614_v17 = vld [vmem:[%s3059_s3 + $0x108] sm:$0xf]  ;;  %v2026_v18 = vld [vmem:[%s3059_s3 + $0x110] sm:$0xf0]  ;;  %v1519_v20 = vor.u32 %v2002_v14, %v1518_v10  ;;  %v1819_v21 = vor.u32 %v2077_v16, %v1818_v15  ;;  %v1506_v22 = vld [vmem:[%s3059_s3 + $0x30] sm:$0xf] }
  0x23   :  { %238 = vmatmul.bf16.vlgmr.msra.gmra.mxu0 %v27_v44  ;;  %v1710_v23 = vld [vmem:[%s3059_s3 + $0x1c8] sm:$0xf]  ;;  %v2050_v24 = vld [vmem:[%s3059_s3 + $0x1d0] sm:$0xf0]  ;;  %v1615_v25 = vor.u32 %v2026_v18, %v1614_v17  ;;  %v1999_v26 = vld [vmem:[%s3059_s3 + $0x38] sm:$0xf0] }
  0x24   :  { %938 = vmatpush.bf16.msrb.mxu0 %v1567_v36  ;;  %251 = vmatmul.bf16.vlgmr.msra.gmra.mxu1 %v27_v44  ;;  %v1806_v27 = vld [vmem:[%s3059_s3 + $0x288] sm:$0xf]  ;;  %v2074_v28 = vld [vmem:[%s3059_s3 + $0x290] sm:$0xf0]  ;;  %v1602_v29 = vld [vmem:[%s3059_s3 + $0xf0] sm:$0xf]  ;;  %v1711_v31 = vor.u32 %v2050_v24, %v1710_v23  ;;  %v1507_v32 = vor.u32 %v1999_v26, %v1506_v22 }
  0x25   :  { %951 = vmatpush.bf16.msrb.mxu1 %v1663_v40  ;;  %264 = vmatmul.bf16.vlgmr.msra.gmra.mxu2 %v27_v44  ;;  %v2023_v30 = vld [vmem:[%s3059_s3 + $0xf8] sm:$0xf0]  ;;  %v1807_v33 = vor.u32 %v2074_v28, %v1806_v27  ;;  %v1494_v34 = vld [vmem:[%s3059_s3 + $0x18] sm:$0xf]  ;;  %v1698_v35 = vld [vmem:[%s3059_s3 + $0x1b0] sm:$0xf] }
  0x26   :  { %277 = vmatmul.bf16.vlgmr.msra.gmra.mxu3 %v27_v44  ;;  %964 = vmatpush.bf16.msrb.mxu2 %v1759_v47  ;;  %v2047_v36 = vld [vmem:[%s3059_s3 + $0x1b8] sm:$0xf0]  ;;  %v1603_v37 = vor.u32 %v2023_v30, %v1602_v29  ;;  %v1996_v38 = vld [vmem:[%s3059_s3 + $0x20] sm:$0xf0]  ;;  %v1794_v39 = vld [vmem:[%s3059_s3 + $0x270] sm:$0xf] }
  0x27   :  { %977 = vmatpush.bf16.msrb.mxu3 %v1855_v49  ;;  %v2071_v40 = vld [vmem:[%s3059_s3 + $0x278] sm:$0xf0]  ;;  %v1590_v41 = vld [vmem:[%s3059_s3 + $0xd8] sm:$0xf]  ;;  %v2020_v42 = vld [vmem:[%s3059_s3 + $0xe0] sm:$0xf0]  ;;  %v1699_v43 = vor.u32 %v2047_v36, %v1698_v35  ;;  %v1495_v46 = vor.u32 %v1996_v38, %v1494_v34 }
  0x28   :  { %939 = vmatpush.bf16.msrb.mxu0 %v1555_v48  ;;  %v1482_v44 = vld [vmem:[%s3059_s3] sm:$0xf]  ;;  %v1993_v45 = vld [vmem:[%s3059_s3 + $0x8] sm:$0xf0]  ;;  %v1795_v47 = vor.u32 %v2071_v40, %v1794_v39  ;;  %v1686_v49 = vld [vmem:[%s3059_s3 + $0x198] sm:$0xf]  ;;  %v1591_v51 = vor.u32 %v2020_v42, %v1590_v41 }
  0x29   :  { %952 = vmatpush.bf16.msrb.mxu1 %v1651_v53  ;;  %v1578_v48 = vld [vmem:[%s3059_s3 + $0xc0] sm:$0xf]  ;;  %v2044_v50 = vld [vmem:[%s3059_s3 + $0x1a0] sm:$0xf0]  ;;  %v2017_v52 = vld [vmem:[%s3059_s3 + $0xc8] sm:$0xf0] }
  0x2a   :  { %965 = vmatpush.bf16.msrb.mxu2 %v1747_v59  ;;  %v1782_v53 = vld [vmem:[%s3059_s3 + $0x258] sm:$0xf]  ;;  %v2068_v54 = vld [vmem:[%s3059_s3 + $0x260] sm:$0xf0]  ;;  %v2013_v55 = vld [vmem:[%s3059_s3 + $0xac] sm:$0xf]  ;;  %v1687_v59 = vor.u32 %v2044_v50, %v1686_v49 }
  0x2b   :  { %978 = vmatpush.bf16.msrb.mxu3 %v1843_v61  ;;  %v1568_v56 = vld [vmem:[%s3059_s3 + $0xb4] sm:$0xf0]  ;;  %v2037_v57 = vld [vmem:[%s3059_s3 + $0x16c] sm:$0xf]  ;;  %v1483_v61 = vor.u32 %v1993_v45, %v1482_v44  ;;  %v1783_v62 = vor.u32 %v2068_v54, %v1782_v53  ;;  %v2010_v63 = vld [vmem:[%s3059_s3 + $0x94] sm:$0xf] }
  0x2c   :  { %940 = vmatpush.bf16.msrb.mxu0 %v1543_v60  ;;  %v1664_v58 = vld [vmem:[%s3059_s3 + $0x174] sm:$0xf0]  ;;  %v1674_v60 = vld [vmem:[%s3059_s3 + $0x180] sm:$0xf]  ;;  %v2041_v0 = vld [vmem:[%s3059_s3 + $0x188] sm:$0xf0] }
  0x2d   :  { %953 = vmatpush.bf16.msrb.mxu1 %v1639_v1  ;;  %v1770_v1 = vld [vmem:[%s3059_s3 + $0x240] sm:$0xf] }
  0x2e   :  { %966 = vmatpush.bf16.msrb.mxu2 %v1735_v7 }
  0x2f   :  { %979 = vmatpush.bf16.msrb.mxu3 %v1831_v9 }
  0x30   :  { %941 = vmatpush.bf16.msrb.mxu0 %v1531_v8 }
  0x31   :  { %954 = vmatpush.bf16.msrb.mxu1 %v1627_v13 }
  0x32   :  { %967 = vmatpush.bf16.msrb.mxu2 %v1723_v19 }
  0x33   :  { %980 = vmatpush.bf16.msrb.mxu3 %v1819_v21 }
  0x34   :  { %942 = vmatpush.bf16.msrb.mxu0 %v1519_v20 }
  0x35   :  { %955 = vmatpush.bf16.msrb.mxu1 %v1615_v25 }
  0x36   :  { %968 = vmatpush.bf16.msrb.mxu2 %v1711_v31 }
  0x37   :  { %981 = vmatpush.bf16.msrb.mxu3 %v1807_v33 }
  0x38   :  { %943 = vmatpush.bf16.msrb.mxu0 %v1507_v32 }
  0x39   :  { %956 = vmatpush.bf16.msrb.mxu1 %v1603_v37 }
  0x3a   :  { %969 = vmatpush.bf16.msrb.mxu2 %v1699_v43 }
  0x3b   :  { %982 = vmatpush.bf16.msrb.mxu3 %v1795_v47 }
  0x3c   :  { %944 = vmatpush.bf16.msrb.mxu0 %v1495_v46 }
  0x3d   :  { %12 = vsyncpa [#allocation3], 0  ;;  %957 = vmatpush.bf16.msrb.mxu1 %v1591_v51  ;;  %v1579_v2 = vor.u32 %v2017_v52, %v1578_v48  ;;  %v1571_v3 = vor.u32 %v2013_v55, %v1568_v56  ;;  %v2065_v4 = vld [vmem:[%s3059_s3 + $0x248] sm:$0xf0]  ;;  %v1760_v6 = vld [vmem:[%s3059_s3 + $0x234] sm:$0xf0]  ;;  %v1667_v7 = vor.u32 %v2037_v57, %v1664_v58  ;;  %v1675_v13 = vor.u32 %v2041_v0, %v1674_v60 }
  0x3e   :  { %v2061_v5 = vld [vmem:[%s3059_s3 + $0x22c] sm:$0xf]  ;;  %v1556_v8 = vld [vmem:[%s3059_s3 + $0x9c] sm:$0xf0]  ;;  %v1856_v10 = vld [vmem:[%s3059_s3 + $0x2f4] sm:$0xf0]  ;;  %970 = vmatpush.bf16.msrb.mxu2 %v1687_v59  ;;  %v1771_v14 = vor.u32 %v2065_v4, %v1770_v1 }
  0x3f   :  { %v2085_v9 = vld [vmem:[%s3059_s3 + $0x2ec] sm:$0xf]  ;;  %v2034_v11 = vld [vmem:[%s3059_s3 + $0x154] sm:$0xf]  ;;  %v1652_v12 = vld [vmem:[%s3059_s3 + $0x15c] sm:$0xf0]  ;;  %983 = vmatpush.bf16.msrb.mxu3 %v1783_v62  ;;  %v1763_v15 = vor.u32 %v2061_v5, %v1760_v6  ;;  %v1559_v16 = vor.u32 %v2010_v63, %v1556_v8 }
  0x40   :  { %945 = vmatpush.bf16.msrb.mxu0 %v1483_v61  ;;  %v1859_v17 = vor.u32 %v2085_v9, %v1856_v10  ;;  %v2007_v18 = vld [vmem:[%s3059_s3 + $0x7c] sm:$0xf]  ;;  %v2058_v19 = vld [vmem:[%s3059_s3 + $0x214] sm:$0xf]  ;;  %v1748_v20 = vld [vmem:[%s3059_s3 + $0x21c] sm:$0xf0]  ;;  %v1655_v21 = vor.u32 %v2034_v11, %v1652_v12 }
  0x41   :  { %958 = vmatpush.bf16.msrb.mxu1 %v1579_v2  ;;  %v1544_v22 = vld [vmem:[%s3059_s3 + $0x84] sm:$0xf0]  ;;  %v2082_v23 = vld [vmem:[%s3059_s3 + $0x2d4] sm:$0xf]  ;;  %v1844_v24 = vld [vmem:[%s3059_s3 + $0x2dc] sm:$0xf0]  ;;  %v1751_v27 = vor.u32 %v2058_v19, %v1748_v20 }
  0x42   :  { %971 = vmatpush.bf16.msrb.mxu2 %v1675_v13  ;;  %v2031_v25 = vld [vmem:[%s3059_s3 + $0x13c] sm:$0xf]  ;;  %v1640_v26 = vld [vmem:[%s3059_s3 + $0x144] sm:$0xf0]  ;;  %v1547_v28 = vor.u32 %v2007_v18, %v1544_v22  ;;  %v1847_v29 = vor.u32 %v2082_v23, %v1844_v24  ;;  %v2004_v30 = vld [vmem:[%s3059_s3 + $0x64] sm:$0xf] }
  0x43   :  { %984 = vmatpush.bf16.msrb.mxu3 %v1771_v14  ;;  %v2055_v31 = vld [vmem:[%s3059_s3 + $0x1fc] sm:$0xf]  ;;  %v1736_v32 = vld [vmem:[%s3059_s3 + $0x204] sm:$0xf0]  ;;  %v1643_v33 = vor.u32 %v2031_v25, %v1640_v26  ;;  %v1532_v34 = vld [vmem:[%s3059_s3 + $0x6c] sm:$0xf0] }
  0x44   :  { %990 = vmatpush.bf16.msra.mxu0 %v1571_v3  ;;  %v2079_v35 = vld [vmem:[%s3059_s3 + $0x2bc] sm:$0xf]  ;;  %v1832_v36 = vld [vmem:[%s3059_s3 + $0x2c4] sm:$0xf0]  ;;  %v2028_v37 = vld [vmem:[%s3059_s3 + $0x124] sm:$0xf]  ;;  %v1739_v39 = vor.u32 %v2055_v31, %v1736_v32  ;;  %v1535_v40 = vor.u32 %v2004_v30, %v1532_v34 }
  0x45   :  { %1003 = vmatpush.bf16.msra.mxu1 %v1667_v7  ;;  %v1628_v38 = vld [vmem:[%s3059_s3 + $0x12c] sm:$0xf0]  ;;  %v1835_v41 = vor.u32 %v2079_v35, %v1832_v36  ;;  %v2001_v42 = vld [vmem:[%s3059_s3 + $0x4c] sm:$0xf]  ;;  %v2052_v43 = vld [vmem:[%s3059_s3 + $0x1e4] sm:$0xf] }
  0x46   :  { %1016 = vmatpush.bf16.msra.mxu2 %v1763_v15  ;;  %v1724_v44 = vld [vmem:[%s3059_s3 + $0x1ec] sm:$0xf0]  ;;  %v1631_v45 = vor.u32 %v2028_v37, %v1628_v38  ;;  %v1520_v46 = vld [vmem:[%s3059_s3 + $0x54] sm:$0xf0]  ;;  %v2076_v47 = vld [vmem:[%s3059_s3 + $0x2a4] sm:$0xf] }
  0x47   :  { %1029 = vmatpush.bf16.msra.mxu3 %v1859_v17  ;;  %v1820_v48 = vld [vmem:[%s3059_s3 + $0x2ac] sm:$0xf0]  ;;  %v2025_v49 = vld [vmem:[%s3059_s3 + $0x10c] sm:$0xf]  ;;  %v1616_v50 = vld [vmem:[%s3059_s3 + $0x114] sm:$0xf0]  ;;  %v1727_v51 = vor.u32 %v2052_v43, %v1724_v44  ;;  %v1523_v52 = vor.u32 %v2001_v42, %v1520_v46 }
  0x48   :  { %991 = vmatpush.bf16.msra.mxu0 %v1559_v16  ;;  %v1823_v53 = vor.u32 %v2076_v47, %v1820_v48  ;;  %v1619_v54 = vor.u32 %v2025_v49, %v1616_v50  ;;  %v1998_v55 = vld [vmem:[%s3059_s3 + $0x34] sm:$0xf]  ;;  %v1508_v56 = vld [vmem:[%s3059_s3 + $0x3c] sm:$0xf0]  ;;  %v2049_v61 = vld [vmem:[%s3059_s3 + $0x1cc] sm:$0xf] }
  0x49   :  { %1004 = vmatpush.bf16.msra.mxu1 %v1655_v21  ;;  %v2022_v57 = vld [vmem:[%s3059_s3 + $0xf4] sm:$0xf]  ;;  %v1604_v58 = vld [vmem:[%s3059_s3 + $0xfc] sm:$0xf0]  ;;  %v1511_v59 = vor.u32 %v1998_v55, %v1508_v56  ;;  %v1712_v62 = vld [vmem:[%s3059_s3 + $0x1d4] sm:$0xf0] }
  0x4a   :  { %1017 = vmatpush.bf16.msra.mxu2 %v1751_v27  ;;  %v1607_v60 = vor.u32 %v2022_v57, %v1604_v58  ;;  %v2073_v63 = vld [vmem:[%s3059_s3 + $0x28c] sm:$0xf]  ;;  %v1715_v0 = vor.u32 %v2049_v61, %v1712_v62  ;;  %v1808_v1 = vld [vmem:[%s3059_s3 + $0x294] sm:$0xf0]  ;;  %v1995_v3 = vld [vmem:[%s3059_s3 + $0x1c] sm:$0xf] }
  0x4b   :  { %1030 = vmatpush.bf16.msra.mxu3 %v1847_v29  ;;  %v1811_v2 = vor.u32 %v2073_v63, %v1808_v1  ;;  %v1496_v4 = vld [vmem:[%s3059_s3 + $0x24] sm:$0xf0]  ;;  %v2019_v5 = vld [vmem:[%s3059_s3 + $0xdc] sm:$0xf]  ;;  %v2046_v9 = vld [vmem:[%s3059_s3 + $0x1b4] sm:$0xf] }
  0x4c   :  { %992 = vmatpush.bf16.msra.mxu0 %v1547_v28  ;;  %v1499_v6 = vor.u32 %v1995_v3, %v1496_v4  ;;  %v1592_v7 = vld [vmem:[%s3059_s3 + $0xe4] sm:$0xf0]  ;;  %v1700_v10 = vld [vmem:[%s3059_s3 + $0x1bc] sm:$0xf0]  ;;  %v2070_v11 = vld [vmem:[%s3059_s3 + $0x274] sm:$0xf] }
  0x4d   :  { %1005 = vmatpush.bf16.msra.mxu1 %v1643_v33  ;;  %v1595_v8 = vor.u32 %v2019_v5, %v1592_v7  ;;  %v1703_v12 = vor.u32 %v2046_v9, %v1700_v10  ;;  %v1796_v13 = vld [vmem:[%s3059_s3 + $0x27c] sm:$0xf0]  ;;  %v1992_v15 = vld [vmem:[%s3059_s3 + $0x4] sm:$0xf]  ;;  %v1484_v16 = vld [vmem:[%s3059_s3 + $0xc] sm:$0xf0] }
  0x4e   :  { %1018 = vmatpush.bf16.msra.mxu2 %v1739_v39  ;;  %v1799_v14 = vor.u32 %v2070_v11, %v1796_v13  ;;  %v1487_v17 = vor.u32 %v1992_v15, %v1484_v16  ;;  %v2016_v18 = vld [vmem:[%s3059_s3 + $0xc4] sm:$0xf]  ;;  %v1580_v19 = vld [vmem:[%s3059_s3 + $0xcc] sm:$0xf0]  ;;  %v2043_v21 = vld [vmem:[%s3059_s3 + $0x19c] sm:$0xf] }
  0x4f   :  { %1031 = vmatpush.bf16.msra.mxu3 %v1835_v41  ;;  %v1583_v20 = vor.u32 %v2016_v18, %v1580_v19  ;;  %v1688_v22 = vld [vmem:[%s3059_s3 + $0x1a4] sm:$0xf0]  ;;  %v2067_v24 = vld [vmem:[%s3059_s3 + $0x25c] sm:$0xf]  ;;  %v2040_v27 = vld [vmem:[%s3059_s3 + $0x184] sm:$0xf] }
  0x50   :  { %993 = vmatpush.bf16.msra.mxu0 %v1535_v40  ;;  %v1691_v23 = vor.u32 %v2043_v21, %v1688_v22  ;;  %v1784_v25 = vld [vmem:[%s3059_s3 + $0x264] sm:$0xf0]  ;;  %v1676_v28 = vld [vmem:[%s3059_s3 + $0x18c] sm:$0xf0]  ;;  %v2064_v30 = vld [vmem:[%s3059_s3 + $0x244] sm:$0xf] }
  0x51   :  { %1006 = vmatpush.bf16.msra.mxu1 %v1631_v45  ;;  %v1787_v26 = vor.u32 %v2067_v24, %v1784_v25  ;;  %v1679_v29 = vor.u32 %v2040_v27, %v1676_v28  ;;  %v1772_v31 = vld [vmem:[%s3059_s3 + $0x24c] sm:$0xf0]  ;;  %v60_v33 = vld [vmem:[%s3058_s2] sm:$0xf]  ;;  %v2015_v40 = vld [vmem:[%s3059_s3 + $0xb8] sm:$0xf0] }
  0x52   :  { %1019 = vmatpush.bf16.msra.mxu2 %v1727_v51  ;;  %v1775_v32 = vor.u32 %v2064_v30, %v1772_v31  ;;  %v62_v34 = vperm.slane %v60_v33, 0  ;;  %v63_v35 = vperm.slane %v60_v33, 1  ;;  %v1574_v39 = vld [vmem:[%s3059_s3 + $0xb0] sm:$0xf]  ;;  %v2039_v43 = vld [vmem:[%s3059_s3 + $0x178] sm:$0xf0] }
  0x53   :  { %1032 = vmatpush.bf16.msra.mxu3 %v1823_v53  ;;  %v1670_v42 = vld [vmem:[%s3059_s3 + $0x170] sm:$0xf]  ;;  %v64_v46 = vperm.slane %v60_v33, 2  ;;  %v1575_v47 = vor.u32 %v2015_v40, %v1574_v39  ;;  %v65_v49 = vperm.slane %v60_v33, 3  ;;  %v1562_v51 = vld [vmem:[%s3059_s3 + $0x98] sm:$0xf] }
  0x54   :  { %994 = vmatpush.bf16.msra.mxu0 %v1523_v52  ;;  %v1671_v50 = vor.u32 %v2039_v43, %v1670_v42  ;;  %v2012_v52 = vld [vmem:[%s3059_s3 + $0xa0] sm:$0xf0]  ;;  %v1766_v61 = vld [vmem:[%s3059_s3 + $0x230] sm:$0xf]  ;;  %v2063_v62 = vld [vmem:[%s3059_s3 + $0x238] sm:$0xf0] }
  0x55   :  { %1007 = vmatpush.bf16.msra.mxu1 %v1619_v54  ;;  %v1658_v54 = vld [vmem:[%s3059_s3 + $0x158] sm:$0xf]  ;;  %v2036_v55 = vld [vmem:[%s3059_s3 + $0x160] sm:$0xf0]  ;;  %v1862_v63 = vld [vmem:[%s3059_s3 + $0x2f0] sm:$0xf]  ;;  %v1767_v10 = vor.u32 %v2063_v62, %v1766_v61 }
  0x56   :  { %1020 = vmatpush.bf16.msra.mxu2 %v1715_v0  ;;  %v2087_v3 = vld [vmem:[%s3059_s3 + $0x2f8] sm:$0xf0]  ;;  %v1550_v4 = vld [vmem:[%s3059_s3 + $0x80] sm:$0xf]  ;;  %v2009_v5 = vld [vmem:[%s3059_s3 + $0x88] sm:$0xf0] }
  0x57   :  { %1033 = vmatpush.bf16.msra.mxu3 %v1811_v2  ;;  %v1659_v2 = vor.u32 %v2036_v55, %v1658_v54  ;;  %v1646_v7 = vld [vmem:[%s3059_s3 + $0x140] sm:$0xf]  ;;  %v1551_v13 = vor.u32 %v2009_v5, %v1550_v4  ;;  %v2060_v15 = vld [vmem:[%s3059_s3 + $0x220] sm:$0xf0]  ;;  %v1850_v16 = vld [vmem:[%s3059_s3 + $0x2d8] sm:$0xf] }
  0x58   :  { %995 = vmatpush.bf16.msra.mxu0 %v1511_v59  ;;  %v2084_v19 = vld [vmem:[%s3059_s3 + $0x2e0] sm:$0xf0]  ;;  %v2006_v21 = vld [vmem:[%s3059_s3 + $0x70] sm:$0xf0]  ;;  %v1634_v22 = vld [vmem:[%s3059_s3 + $0x128] sm:$0xf] }
  0x59   :  { %1008 = vmatpush.bf16.msra.mxu1 %v1607_v60  ;;  %v1563_v60 = vor.u32 %v2012_v52, %v1562_v51  ;;  %v1851_v27 = vor.u32 %v2084_v19, %v1850_v16  ;;  %v2057_v30 = vld [vmem:[%s3059_s3 + $0x208] sm:$0xf0]  ;;  %v1730_v40 = vld [vmem:[%s3059_s3 + $0x1e8] sm:$0xf]  ;;  %v1718_v54 = vld [vmem:[%s3059_s3 + $0x1d0] sm:$0xf] }
  0x5a   :  { %1021 = vmatpush.bf16.msra.mxu2 %v1703_v12  ;;  %v1863_v12 = vor.u32 %v2087_v3, %v1862_v63  ;;  %v2081_v33 = vld [vmem:[%s3059_s3 + $0x2c8] sm:$0xf0]  ;;  %v2051_v55 = vld [vmem:[%s3059_s3 + $0x1d8] sm:$0xf0]  ;;  %v1598_v62 = vld [vmem:[%s3059_s3 + $0xe0] sm:$0xf] }
  0x5b   :  { %1034 = vmatpush.bf16.msra.mxu3 %v1799_v14  ;;  %v1754_v14 = vld [vmem:[%s3059_s3 + $0x218] sm:$0xf]  ;;  %v1997_v61 = vld [vmem:[%s3059_s3 + $0x28] sm:$0xf0]  ;;  %v2048_v3 = vld [vmem:[%s3059_s3 + $0x1c0] sm:$0xf0] }
  0x5c   :  { %996 = vmatpush.bf16.msra.mxu0 %v1499_v6  ;;  %v1755_v25 = vor.u32 %v2060_v15, %v1754_v14  ;;  %v2021_v63 = vld [vmem:[%s3059_s3 + $0xe8] sm:$0xf0]  ;;  %v1694_v15 = vld [vmem:[%s3059_s3 + $0x1a0] sm:$0xf]  ;;  %s2140_s18 = smov [#allocation2]   ;;  %s1343_s1 = sshll.u32 %s3063_s7, 4  ;;  %s1344_s1 = int_to_ptr.hbm [resolvable:$true] %s1343_s1 }
  0x5d   :  { %1009 = vmatpush.bf16.msra.mxu1 %v1595_v8  ;;  %v2033_v8 = vld [vmem:[%s3059_s3 + $0x148] sm:$0xf0]  ;;  %v1599_v5 = vor.u32 %v2021_v63, %v1598_v62  ;;  %s1341_s19 = sshll.u32 %s2140_s18, 4  ;;  %s1342_s19 = int_to_ptr.vmem [resolvable:$true] %s1341_s19 }
  0x5e   :  { %1022 = vmatpush.bf16.msra.mxu2 %v1691_v23  ;;  %v1647_v18 = vor.u32 %v2033_v8, %v1646_v7  ;;  %v2030_v23 = vld [vmem:[%s3059_s3 + $0x130] sm:$0xf0]  ;;  %v2072_v7 = vld [vmem:[%s3059_s3 + $0x280] sm:$0xf0]  ;;  %v1490_v8 = vld [vmem:[%s3059_s3 + $0x8] sm:$0xf] }
  0x5f   :  { %1035 = vmatpush.bf16.msra.mxu3 %v1787_v26  ;;  %v1635_v31 = vor.u32 %v2030_v23, %v1634_v22  ;;  %v2045_v16 = vld [vmem:[%s3059_s3 + $0x1a8] sm:$0xf0]  ;;  %v2095_v22 = vld [vmem:[%s3061_s5 + $0x38] sm:$0xff] }
  0x60   :  { %997 = vmatpush.bf16.msra.mxu0 %v1487_v17  ;;  %v1695_v23 = vor.u32 %v2045_v16, %v1694_v15 }
  0x61   :  { %1010 = vmatpush.bf16.msra.mxu1 %v1583_v20  ;;  %v1538_v20 = vld [vmem:[%s3059_s3 + $0x68] sm:$0xf] }
  0x62   :  { %1023 = vmatpush.bf16.msra.mxu2 %v1679_v29  ;;  %v1539_v28 = vor.u32 %v2006_v21, %v1538_v20  ;;  %v1742_v29 = vld [vmem:[%s3059_s3 + $0x200] sm:$0xf]  ;;  %v2069_v21 = vld [vmem:[%s3059_s3 + $0x268] sm:$0xf0] }
  0x63   :  { %1036 = vmatpush.bf16.msra.mxu3 %v1775_v32  ;;  %v1838_v32 = vld [vmem:[%s3059_s3 + $0x2c0] sm:$0xf] }
  0x64   :  { %v1839_v39 = vor.u32 %v2081_v33, %v1838_v32  ;;  %v1790_v20 = vld [vmem:[%s3059_s3 + $0x260] sm:$0xf]  ;;  %v2093_v32 = vld [vmem:[%s3061_s5 + $0x28] sm:$0xff] }
  0x65   :  { %v2092_v33 = vld [vmem:[%s3061_s5 + $0x20] sm:$0xff] }
  0xa0   :  { %v239_v36 = vpop.f32.mrf.mxu0 }
  0xa1   :  { %v240_v37 = vadd.f32 %v239_v36, %v62_v34  ;;  %v252_v38 = vpop.f32.mrf.mxu1  ;;  %v1526_v34 = vld [vmem:[%s3059_s3 + $0x50] sm:$0xf] }
  0xa2   :  { %v253_v41 = vadd.f32 %v252_v38, %v63_v35  ;;  %v2003_v35 = vld [vmem:[%s3059_s3 + $0x58] sm:$0xf0]  ;;  %v1622_v36 = vld [vmem:[%s3059_s3 + $0x110] sm:$0xf]  ;;  %v1743_v38 = vor.u32 %v2057_v30, %v1742_v29 }
  0xa3   :  { %v282_v44 = vmax.f32 %v240_v37, 0.0  ;;  %v2027_v37 = vld [vmem:[%s3059_s3 + $0x118] sm:$0xf0]  ;;  %v1527_v42 = vor.u32 %v2003_v35, %v1526_v34  ;;  %v2094_v29 = vld [vmem:[%s3061_s5 + $0x30] sm:$0xff]  ;;  %v2089_v34 = vld [vmem:[%s3061_s5 + $0x8] sm:$0xff] }
  0xa4   :  { %v283_v45 = vmax.f32 %v253_v41, 0.0  ;;  %v2054_v41 = vld [vmem:[%s3059_s3 + $0x1f0] sm:$0xf0]  ;;  %v1623_v43 = vor.u32 %v2027_v37, %v1622_v36  ;;  %v2101_v35 = vld [vmem:[%s3061_s5 + $0x68] sm:$0xff]  ;;  %v2088_v36 = vld [vmem:[%s3061_s5] sm:$0xff] }
  0xa5   :  { %v2775_v48 = vpack.c.bf16 %v282_v44, %v282_v44  ;;  %v1826_v44 = vld [vmem:[%s3059_s3 + $0x2a8] sm:$0xf]  ;;  %v1731_v51 = vor.u32 %v2054_v41, %v1730_v40  ;;  %v2100_v37 = vld [vmem:[%s3061_s5 + $0x60] sm:$0xff]  ;;  %v2098_v40 = vld [vmem:[%s3061_s5 + $0x50] sm:$0xff] }
  0xa6   :  { %v2783_v53 = vpack.c.bf16 %v283_v45, %v283_v45  ;;  %v2078_v45 = vld [vmem:[%s3059_s3 + $0x2b0] sm:$0xf0] }
  0xa7   :  { %946 = vmatmul.bf16.vlgmr.msrb.gmra.mxu0 %v2775_v48  ;;  %v1827_v52 = vor.u32 %v2078_v45, %v1826_v44  ;;  %v2110_v41 = vld [vmem:[%s3061_s5 + $0xb0] sm:$0xff]  ;;  %v418_v44 = vld [vmem:[%s3060_s4] sm:$0x7] }
  0xa8   :  { %v265_v56 = vpop.f32.mrf.mxu2  ;;  %959 = vmatmul.bf16.vlgmr.msrb.gmra.mxu1 %v2783_v53  ;;  %v241_v59 = vpop.f32.mrf.mxu0  ;;  %1042 = vmatpush.bf16.msrb.mxu0 %v1575_v47  ;;  %v2000_v47 = vld [vmem:[%s3059_s3 + $0x40] sm:$0xf0] }
  0xa9   :  { %v266_v57 = vadd.f32 %v265_v56, %v64_v46  ;;  %v278_v58 = vpop.f32.mrf.mxu3  ;;  %1055 = vmatpush.bf16.msrb.mxu1 %v1671_v50  ;;  %v254_v1 = vpop.f32.mrf.mxu1  ;;  %v1514_v46 = vld [vmem:[%s3059_s3 + $0x38] sm:$0xf]  ;;  %v2024_v50 = vld [vmem:[%s3059_s3 + $0x100] sm:$0xf0]  ;;  %v2075_v59 = vld [vmem:[%s3059_s3 + $0x298] sm:$0xf0] }
  0xaa   :  { %v279_v0 = vadd.f32 %v278_v58, %v65_v49  ;;  %v1610_v49 = vld [vmem:[%s3059_s3 + $0xf8] sm:$0xf]  ;;  %v1515_v56 = vor.u32 %v2000_v47, %v1514_v46  ;;  %v1814_v58 = vld [vmem:[%s3059_s3 + $0x290] sm:$0xf]  ;;  %v420_v47 = vperm.slane %v418_v44, 0 }
  0xab   :  { %v284_v6 = vmax.f32 %v266_v57, 0.0  ;;  %v1611_v57 = vor.u32 %v2024_v50, %v1610_v49  ;;  %v1815_v1 = vor.u32 %v2075_v59, %v1814_v58  ;;  %v2096_v49 = vld [vmem:[%s3061_s5 + $0x40] sm:$0xff] }
  0xac   :  { %v285_v9 = vmax.f32 %v279_v0, 0.0  ;;  %1043 = vmatpush.bf16.msrb.mxu0 %v1563_v60  ;;  %v1502_v60 = vld [vmem:[%s3059_s3 + $0x20] sm:$0xf]  ;;  %v1719_v0 = vor.u32 %v2051_v55, %v1718_v54 }
  0xad   :  { %v2817_v11 = vpack.c.bf16 %v284_v6, %v284_v6  ;;  %1056 = vmatpush.bf16.msrb.mxu1 %v1659_v2  ;;  %v1706_v2 = vld [vmem:[%s3059_s3 + $0x1b8] sm:$0xf]  ;;  %v1503_v4 = vor.u32 %v1997_v61, %v1502_v60  ;;  %v2108_v50 = vld [vmem:[%s3061_s5 + $0xa0] sm:$0xff]  ;;  %v2105_v61 = vld [vmem:[%s3061_s5 + $0x88] sm:$0xff] }
  0xae   :  { %v2828_v17 = vpack.c.bf16 %v285_v9, %v285_v9  ;;  %v1802_v6 = vld [vmem:[%s3059_s3 + $0x278] sm:$0xf]  ;;  %v1994_v9 = vld [vmem:[%s3059_s3 + $0x10] sm:$0xf0] }
  0xaf   :  { %972 = vmatmul.bf16.vlgmr.msrb.gmra.mxu2 %v2817_v11  ;;  %v1803_v14 = vor.u32 %v2072_v7, %v1802_v6 }
  0xb0   :  { %985 = vmatmul.bf16.vlgmr.msrb.gmra.mxu3 %v2828_v17  ;;  %v267_v24 = vpop.f32.mrf.mxu2  ;;  %1068 = vmatpush.bf16.msrb.mxu2 %v1767_v10  ;;  %v1586_v10 = vld [vmem:[%s3059_s3 + $0xc8] sm:$0xf] }
  0xb1   :  { %v280_v26 = vpop.f32.mrf.mxu3  ;;  %1081 = vmatpush.bf16.msrb.mxu3 %v1863_v12  ;;  %1044 = vmatpush.bf16.msrb.mxu0 %v1551_v13  ;;  %v2018_v12 = vld [vmem:[%s3059_s3 + $0xd0] sm:$0xf0]  ;;  %v1707_v13 = vor.u32 %v2048_v3, %v1706_v2  ;;  %v1791_v24 = vor.u32 %v2069_v21, %v1790_v20  ;;  %v2104_v2 = vld [vmem:[%s3061_s5 + $0x80] sm:$0xff]  ;;  %v422_v21 = vperm.slane %v418_v44, 2 }
  0xb2   :  { %1057 = vmatpush.bf16.msrb.mxu1 %v1647_v18  ;;  %v1491_v18 = vor.u32 %v1994_v9, %v1490_v8  ;;  %v1587_v19 = vor.u32 %v2018_v12, %v1586_v10  ;;  %v2042_v26 = vld [vmem:[%s3059_s3 + $0x190] sm:$0xf0] }
  0xb4   :  { %1069 = vmatpush.bf16.msrb.mxu2 %v1755_v25  ;;  %v1682_v25 = vld [vmem:[%s3059_s3 + $0x188] sm:$0xf] }
  0xb5   :  { %1082 = vmatpush.bf16.msrb.mxu3 %v1851_v27  ;;  %1045 = vmatpush.bf16.msrb.mxu0 %v1539_v28  ;;  %v1778_v27 = vld [vmem:[%s3059_s3 + $0x248] sm:$0xf]  ;;  %v2066_v28 = vld [vmem:[%s3059_s3 + $0x250] sm:$0xf0]  ;;  %v1683_v30 = vor.u32 %v2042_v26, %v1682_v25 }
  0xb6   :  { %1058 = vmatpush.bf16.msrb.mxu1 %v1635_v31  ;;  %v1779_v31 = vor.u32 %v2066_v28, %v1778_v27 }
  0xb7   :  { %998 = vmatmul.bf16.vlgmr.msra.gmra.mxu0 %v2775_v48 }
  0xb8   :  { %1070 = vmatpush.bf16.msrb.mxu2 %v1743_v38  ;;  %1011 = vmatmul.bf16.vlgmr.msra.gmra.mxu1 %v2783_v53  ;;  %v2099_v38 = vld [vmem:[%s3061_s5 + $0x58] sm:$0xff] }
  0xb9   :  { %1083 = vmatpush.bf16.msrb.mxu3 %v1839_v39  ;;  %1046 = vmatpush.bf16.msrb.mxu0 %v1527_v42  ;;  %v2111_v39 = vld [vmem:[%s3061_s5 + $0xb8] sm:$0xff]  ;;  %v2097_v42 = vld [vmem:[%s3061_s5 + $0x48] sm:$0xff] }
  0xba   :  { %1059 = vmatpush.bf16.msrb.mxu1 %v1623_v43  ;;  %v2109_v43 = vld [vmem:[%s3061_s5 + $0xa8] sm:$0xff] }
  0xbc   :  { %1071 = vmatpush.bf16.msrb.mxu2 %v1731_v51 }
  0xbd   :  { %1084 = vmatpush.bf16.msrb.mxu3 %v1827_v52  ;;  %1047 = vmatpush.bf16.msrb.mxu0 %v1515_v56  ;;  %v2107_v52 = vld [vmem:[%s3061_s5 + $0x98] sm:$0xff] }
  0xbe   :  { %1060 = vmatpush.bf16.msrb.mxu1 %v1611_v57  ;;  %v2106_v57 = vld [vmem:[%s3061_s5 + $0x90] sm:$0xff] }
  0xbf   :  { %1024 = vmatmul.bf16.vlgmr.msra.gmra.mxu2 %v2817_v11 }
  0xc0   :  { %1037 = vmatmul.bf16.vlgmr.msra.gmra.mxu3 %v2828_v17  ;;  %1072 = vmatpush.bf16.msrb.mxu2 %v1719_v0 }
  0xc1   :  { %1085 = vmatpush.bf16.msrb.mxu3 %v1815_v1  ;;  %1048 = vmatpush.bf16.msrb.mxu0 %v1503_v4  ;;  %v421_v4 = vperm.slane %v418_v44, 1 }
  0xc2   :  { %1061 = vmatpush.bf16.msrb.mxu1 %v1599_v5 }
  0xc4   :  { %1073 = vmatpush.bf16.msrb.mxu2 %v1707_v13 }
  0xc5   :  { %1086 = vmatpush.bf16.msrb.mxu3 %v1803_v14  ;;  %1049 = vmatpush.bf16.msrb.mxu0 %v1491_v18 }
  0xc6   :  { %1062 = vmatpush.bf16.msrb.mxu1 %v1587_v19 }
  0xc8   :  { %1074 = vmatpush.bf16.msrb.mxu2 %v1695_v23  ;;  %1050 = vmatmul.bf16.vlgmr.msrb.gmra.mxu0 %v2775_v48  ;;  %v2103_v48 = vld [vmem:[%s3061_s5 + $0x78] sm:$0xff] }
  0xc9   :  { %1296 = vmatpush.bf16.msra.mxu0 %v2095_v22  ;;  %1087 = vmatpush.bf16.msrb.mxu3 %v1791_v24 }
  0xca   :  { %1063 = vmatmul.bf16.vlgmr.msrb.gmra.mxu1 %v2783_v53  ;;  %v2091_v53 = vld [vmem:[%s3061_s5 + $0x18] sm:$0xff] }
  0xcb   :  { %1309 = vmatpush.bf16.msra.mxu1 %v2103_v48 }
  0xcc   :  { %1075 = vmatpush.bf16.msrb.mxu2 %v1683_v30 }
  0xcd   :  { %1297 = vmatpush.bf16.msra.mxu0 %v2094_v29  ;;  %1088 = vmatpush.bf16.msrb.mxu3 %v1779_v31 }
  0xcf   :  { %1076 = vmatmul.bf16.vlgmr.msrb.gmra.mxu2 %v2817_v11  ;;  %v2090_v11 = vld [vmem:[%s3061_s5 + $0x10] sm:$0xff] }
  0xd0   :  { %1089 = vmatmul.bf16.vlgmr.msrb.gmra.mxu3 %v2828_v17  ;;  %v2102_v17 = vld [vmem:[%s3061_s5 + $0x70] sm:$0xff]  ;;  %1322 = vmatpush.bf16.msra.mxu2 %v2111_v39 }
  0xd1   :  { %1298 = vmatpush.bf16.msra.mxu0 %v2093_v32  ;;  %1310 = vmatpush.bf16.msra.mxu1 %v2102_v17 }
  0xd4   :  { %1323 = vmatpush.bf16.msra.mxu2 %v2110_v41 }
  0xd5   :  { %1299 = vmatpush.bf16.msra.mxu0 %v2092_v33  ;;  %1311 = vmatpush.bf16.msra.mxu1 %v2101_v35 }
  0xd8   :  { %1324 = vmatpush.bf16.msra.mxu2 %v2109_v43 }
  0xd9   :  { %1300 = vmatpush.bf16.msra.mxu0 %v2091_v53  ;;  %1312 = vmatpush.bf16.msra.mxu1 %v2100_v37 }
  0xdc   :  { %1325 = vmatpush.bf16.msra.mxu2 %v2108_v50 }
  0xdd   :  { %1301 = vmatpush.bf16.msra.mxu0 %v2090_v11  ;;  %1313 = vmatpush.bf16.msra.mxu1 %v2099_v38 }
  0xe0   :  { %1326 = vmatpush.bf16.msra.mxu2 %v2107_v52 }
  0xe1   :  { %1302 = vmatpush.bf16.msra.mxu0 %v2089_v34  ;;  %1314 = vmatpush.bf16.msra.mxu1 %v2098_v40 }
  0xe4   :  { %1327 = vmatpush.bf16.msra.mxu2 %v2106_v57 }
  0xe5   :  { %1303 = vmatpush.bf16.msra.mxu0 %v2088_v36  ;;  %1315 = vmatpush.bf16.msra.mxu1 %v2097_v42  ;;  %v2113_v36 = vld [vmem:[%s3062_s6] ss:$0 sm:$0xff] }
  0xe8   :  { %1328 = vmatpush.bf16.msra.mxu2 %v2105_v61 }
  0xe9   :  { %1316 = vmatpush.bf16.msra.mxu1 %v2096_v49 }
  0xec   :  { %1329 = vmatpush.bf16.msra.mxu2 %v2104_v2 }
 0x124   :  { %v947_v45 = vpop.f32.mrf.mxu0 }
 0x125   :  { %v960_v46 = vpop.f32.mrf.mxu1  ;;  %v948_v51 = vadd.f32 %v947_v45, %v420_v47 }
 0x127   :  { %v961_v56 = vadd.f32 %v960_v46, %v948_v51 }
 0x12c   :  { %v949_v54 = vpop.f32.mrf.mxu0 }
 0x12d   :  { %v962_v55 = vpop.f32.mrf.mxu1 }
 0x132   :  { %v973_v58 = vpop.f32.mrf.mxu2 }
 0x133   :  { %v974_v59 = vadd.f32 %v973_v58, %v961_v56  ;;  %v986_v60 = vpop.f32.mrf.mxu3 }
 0x134   :  { %v999_v63 = vpop.f32.mrf.mxu0 }
 0x135   :  { %v987_v62 = vadd.f32 %v986_v60, %v974_v59  ;;  %v1012_v0 = vpop.f32.mrf.mxu1  ;;  %v1000_v7 = vadd.f32 %v999_v63, %v421_v4 }
 0x137   :  { %v1094_v1 = vmax.f32 %v987_v62, 0.0  ;;  %v1013_v10 = vadd.f32 %v1012_v0, %v1000_v7 }
 0x139   :  { %v1097_v3 = vpack.c.bf16 %v1094_v1, %v1094_v1 }
 0x13a   :  { %v975_v5 = vpop.f32.mrf.mxu2 }
 0x13b   :  { %v988_v6 = vpop.f32.mrf.mxu3  ;;  %1304 = vmatmul.bf16.vlgmr.msra.gmra.mxu0 %v1097_v3 }
 0x13c   :  { %v1001_v8 = vpop.f32.mrf.mxu0 }
 0x13d   :  { %v1014_v9 = vpop.f32.mrf.mxu1 }
 0x142   :  { %v1025_v12 = vpop.f32.mrf.mxu2 }
 0x143   :  { %v1026_v13 = vadd.f32 %v1025_v12, %v1013_v10  ;;  %v1038_v14 = vpop.f32.mrf.mxu3 }
 0x145   :  { %v1039_v15 = vadd.f32 %v1038_v14, %v1026_v13  ;;  %v1051_v16 = vpop.f32.mrf.mxu0 }
 0x146   :  { %v1052_v24 = vadd.f32 %v1051_v16, %v422_v21 }
 0x147   :  { %v1095_v18 = vmax.f32 %v1039_v15, 0.0  ;;  %v1064_v19 = vpop.f32.mrf.mxu1 }
 0x148   :  { %v1065_v27 = vadd.f32 %v1064_v19, %v1052_v24 }
 0x149   :  { %v1098_v20 = vpack.c.bf16 %v1095_v18, %v1095_v18 }
 0x14a   :  { %v1027_v22 = vpop.f32.mrf.mxu2 }
 0x14b   :  { %v1040_v23 = vpop.f32.mrf.mxu3  ;;  %1317 = vmatmul.bf16.vlgmr.msra.gmra.mxu1 %v1098_v20 }
 0x14d   :  { %v1053_v25 = vpop.f32.mrf.mxu0 }
 0x14f   :  { %v1066_v26 = vpop.f32.mrf.mxu1 }
 0x152   :  { %v1077_v28 = vpop.f32.mrf.mxu2 }
 0x153   :  { %v1078_v29 = vadd.f32 %v1077_v28, %v1065_v27  ;;  %v1090_v30 = vpop.f32.mrf.mxu3 }
 0x155   :  { %v1091_v31 = vadd.f32 %v1090_v30, %v1078_v29 }
 0x157   :  { %v1096_v32 = vmax.f32 %v1091_v31, 0.0 }
 0x159   :  { %v1099_v33 = vpack.c.bf16 %v1096_v32, %v1096_v32 }
 0x15a   :  { %v1079_v48 = vpop.f32.mrf.mxu2 }
 0x15b   :  { %v1092_v53 = vpop.f32.mrf.mxu3  ;;  %1330 = vmatmul.bf16.vlgmr.msra.gmra.mxu2 %v1099_v33 }
 0x1b8   :  { %v1305_v11 = vpop.f32.mrf.mxu0 }
 0x1b9   :  { %v1306_v37 = vadd.f32 %v2113_v36, %v1305_v11 }
 0x1c0   :  { %v1307_v17 = vpop.f32.mrf.mxu0 }
 0x1c8   :  { %v1318_v34 = vpop.f32.mrf.mxu1 }
 0x1c9   :  { %v1319_v38 = vadd.f32 %v1318_v34, %v1306_v37 }
 0x1d0   :  { %v1320_v35 = vpop.f32.mrf.mxu1 }
 0x1de   :  { %v1331_v39 = vpop.f32.mrf.mxu2 }
 0x1df   :  { %v1332_v40 = vadd.f32 %v1331_v39, %v1319_v38 }
 0x1e1   :  { %1335 = vst [vmem:[#allocation2] sm:$0xff] %v1332_v40 }
 0x1e2   :  { %1346 = dma.vmem_to_hbm [thread:$0]  %s1342_s19, 128, %s1344_s1, [#allocation3]  }
 0x1e6   :  { %v1333_v41 = vpop.f32.mrf.mxu2 }
 0x1e7   :  { %2138 = dma.done.wait [#allocation3], 128  }
 0x1e8   :  { %2139 = vsyncadd [#allocation3], 4294967168 }
 0x1e9   :  { %1351 = vsyncpa [#allocation3], 1 }

</bundles_post_ra>
